<compile_context>
chip_gen: v5e
topology: v5e:2x2
jax: 0.10.0
libtpu: 0.0.40
codegen_flags: <defaults>
</compile_context>

<pallas_src>
import jax
import jax.numpy as jnp
from jax.experimental import pallas as pl
from jax.experimental.pallas import tpu as pltpu


def _round_up(v, m):
    return ((v + m - 1) // m) * m


# -----------------------------------------------------------------------------
# Pallas kernel: elementwise max over the 8 window taps (pure VPU work)
# -----------------------------------------------------------------------------
def _maxpool8_kernel(t_ref, o_ref):
    # t_ref: (8, tr, tl)   o_ref: (tr, tl)
    m01 = jnp.maximum(t_ref[0], t_ref[1])
    m23 = jnp.maximum(t_ref[2], t_ref[3])
    m45 = jnp.maximum(t_ref[4], t_ref[5])
    m67 = jnp.maximum(t_ref[6], t_ref[7])
    o_ref[...] = jnp.maximum(jnp.maximum(m01, m23), jnp.maximum(m45, m67))


# -----------------------------------------------------------------------------
# Wrapper: MaxPool3d(kernel_size=2, stride=2) on NCDHW input (PyTorch semantics)
# -----------------------------------------------------------------------------
def max_pool3d_2x2x2(x):
    B, C, D, H, W = x.shape
    Do, Ho, Wo = D // 2, H // 2, W // 2
    assert Do > 0 and Ho > 0 and Wo > 0, "spatial dims must be >= 2"

    # Trim odd tails (PyTorch floor mode), expose the 2x2x2 windows, and move the
    # 8 window taps to a leading axis.  One XLA transpose; the result is
    # (8, R, L) with L = Do*Ho*Wo on the lane-dense trailing axis.
    xt = x[:, :, :2 * Do, :2 * Ho, :2 * Wo]
    xr = xt.reshape(B, C, Do, 2, Ho, 2, Wo, 2)
    taps = jnp.transpose(xr, (3, 5, 7, 0, 1, 2, 4, 6)).reshape(
        8, B * C, Do * Ho * Wo)

    R, L = B * C, Do * Ho * Wo
    itemsize = jnp.dtype(x.dtype).itemsize
    sub = {4: 8, 2: 16, 1: 32}.get(itemsize, 8)   # min sublane multiple per dtype

    # Lane tile: largest power-of-two multiple of 128 (<= 4096) dividing padded L.
    Lp = _round_up(L, 128)
    tl = 128
    for cand in (4096, 2048, 1024, 512, 256, 128):
        if Lp % cand == 0:
            tl = cand
            break

    # Row tile: grow while the (double-buffered) input block stays small.
    Rp = _round_up(R, sub)
    tr = sub
    for cand in (8 * sub, 4 * sub, 2 * sub, sub):
        if Rp % cand == 0 and 8 * cand * tl * itemsize <= 4 * 1024 * 1024:
            tr = cand
            break

    # Pad only when required (padded positions never touch real outputs:
    # the kernel is purely elementwise along (row, lane)).
    if (Rp, Lp) != (R, L):
        taps = jnp.pad(taps, ((0, 0), (0, Rp - R), (0, Lp - L)))

    out = pl.pallas_call(
        _maxpool8_kernel,
        out_shape=jax.ShapeDtypeStruct((Rp, Lp), x.dtype),
        grid_spec=pltpu.PrefetchScalarGridSpec(
            num_scalar_prefetch=0,
            grid=(Rp // tr, Lp // tl),
            in_specs=[pl.BlockSpec((8, tr, tl), lambda i, j: (0, i, j))],
            out_specs=pl.BlockSpec((tr, tl), lambda i, j: (i, j)),
        ),
        compiler_params=pltpu.CompilerParams(
            dimension_semantics=("parallel", "parallel")),
        cost_estimate=pl.CostEstimate(
            flops=7 * Rp * Lp,
            transcendentals=0,
            bytes_accessed=(8 * Rp * Lp + Rp * Lp) * itemsize),
    )(taps)

    out = out[:R, :L]
    return out.reshape(B, C, Do, Ho, Wo)


# MaxPoolBlock.forward(x) == MaxPool3d(kernel_size=2, stride=2)(x)
def max_pool_block_apply(x):
    return max_pool3d_2x2x2(x)


# -----------------------------------------------------------------------------
# Main
# -----------------------------------------------------------------------------
if __name__ == "__main__":
    B, C, D, H, W = 2, 4, 16, 16, 16
    x = jax.random.normal(jax.random.PRNGKey(0), (B, C, D, H, W), jnp.float32)

    y = max_pool_block_apply(x)
    y = jax.block_until_ready(y)

    assert y.shape == (B, C, D // 2, H // 2, W // 2), y.shape
    assert bool(jnp.all(jnp.isfinite(y)))

    # Pure-JAX reference (exact: max of identical f32 values).
    ref = jnp.max(
        x.reshape(B, C, D // 2, 2, H // 2, 2, W // 2, 2), axis=(3, 5, 7))
    assert bool(jnp.allclose(y, ref)), "mismatch vs. reference max-pool"

    print("KERNEL_OK")
</pallas_src>

<mosaic_0001>
module attributes {stable_mosaic.version = 11 : i64} {
  func.func @_maxpool8_kernel(%arg0: i32, %arg1: i32, %arg2: memref<8x8x512xf32, #tpu.memory_space<vmem>>, %arg3: memref<8x512xf32, #tpu.memory_space<vmem>>) attributes {dimension_semantics = [#tpu.dimension_semantics<parallel>, #tpu.dimension_semantics<parallel>], iteration_bounds = array<i64: 1, 1>, scalar_prefetch = 0 : i64, scratch_operands = 0 : i64, tpu.core_type = #tpu.core_type<tc>, window_params = [{transform_indices = @transform_0, window_bounds = array<i64: 8, 8, 512>}, {transform_indices = @transform_1, window_bounds = array<i64: 8, 512>}]} {
    %c0 = arith.constant 0 : index
    %c0_0 = arith.constant 0 : index
    %c0_1 = arith.constant 0 : index
    %0 = vector.load %arg2[%c0, %c0_0, %c0_1] : memref<8x8x512xf32, #tpu.memory_space<vmem>>, vector<1x8x512xf32>
    %1 = vector.shape_cast %0 : vector<1x8x512xf32> to vector<8x512xf32>
    %c1 = arith.constant 1 : index
    %c0_2 = arith.constant 0 : index
    %c0_3 = arith.constant 0 : index
    %2 = vector.load %arg2[%c1, %c0_2, %c0_3] : memref<8x8x512xf32, #tpu.memory_space<vmem>>, vector<1x8x512xf32>
    %3 = vector.shape_cast %2 : vector<1x8x512xf32> to vector<8x512xf32>
    %4 = arith.maximumf %1, %3 : vector<8x512xf32>
    %c2 = arith.constant 2 : index
    %c0_4 = arith.constant 0 : index
    %c0_5 = arith.constant 0 : index
    %5 = vector.load %arg2[%c2, %c0_4, %c0_5] : memref<8x8x512xf32, #tpu.memory_space<vmem>>, vector<1x8x512xf32>
    %6 = vector.shape_cast %5 : vector<1x8x512xf32> to vector<8x512xf32>
    %c3 = arith.constant 3 : index
    %c0_6 = arith.constant 0 : index
    %c0_7 = arith.constant 0 : index
    %7 = vector.load %arg2[%c3, %c0_6, %c0_7] : memref<8x8x512xf32, #tpu.memory_space<vmem>>, vector<1x8x512xf32>
    %8 = vector.shape_cast %7 : vector<1x8x512xf32> to vector<8x512xf32>
    %9 = arith.maximumf %6, %8 : vector<8x512xf32>
    %c4 = arith.constant 4 : index
    %c0_8 = arith.constant 0 : index
    %c0_9 = arith.constant 0 : index
    %10 = vector.load %arg2[%c4, %c0_8, %c0_9] : memref<8x8x512xf32, #tpu.memory_space<vmem>>, vector<1x8x512xf32>
    %11 = vector.shape_cast %10 : vector<1x8x512xf32> to vector<8x512xf32>
    %c5 = arith.constant 5 : index
    %c0_10 = arith.constant 0 : index
    %c0_11 = arith.constant 0 : index
    %12 = vector.load %arg2[%c5, %c0_10, %c0_11] : memref<8x8x512xf32, #tpu.memory_space<vmem>>, vector<1x8x512xf32>
    %13 = vector.shape_cast %12 : vector<1x8x512xf32> to vector<8x512xf32>
    %14 = arith.maximumf %11, %13 : vector<8x512xf32>
    %c6 = arith.constant 6 : index
    %c0_12 = arith.constant 0 : index
    %c0_13 = arith.constant 0 : index
    %15 = vector.load %arg2[%c6, %c0_12, %c0_13] : memref<8x8x512xf32, #tpu.memory_space<vmem>>, vector<1x8x512xf32>
    %16 = vector.shape_cast %15 : vector<1x8x512xf32> to vector<8x512xf32>
    %c7 = arith.constant 7 : index
    %c0_14 = arith.constant 0 : index
    %c0_15 = arith.constant 0 : index
    %17 = vector.load %arg2[%c7, %c0_14, %c0_15] : memref<8x8x512xf32, #tpu.memory_space<vmem>>, vector<1x8x512xf32>
    %18 = vector.shape_cast %17 : vector<1x8x512xf32> to vector<8x512xf32>
    %19 = arith.maximumf %16, %18 : vector<8x512xf32>
    %20 = arith.maximumf %4, %9 : vector<8x512xf32>
    %21 = arith.maximumf %14, %19 : vector<8x512xf32>
    %22 = arith.maximumf %20, %21 : vector<8x512xf32>
    %c0_16 = arith.constant 0 : index
    %c0_17 = arith.constant 0 : index
    %23 = vector.load %arg3[%c0_16, %c0_17] : memref<8x512xf32, #tpu.memory_space<vmem>>, vector<8x512xf32>
    tpu.vector_store %arg3[%c0_16, %c0_17], %22 {strides = array<i32>} : memref<8x512xf32, #tpu.memory_space<vmem>>, vector<8x512xf32>,
    return
  }
  func.func @transform_0(%arg0: i32, %arg1: i32) -> (i32, i32, i32) {
    %c0_i32 = arith.constant 0 : i32
    %c0_i32_0 = arith.constant 0 : i32
    return %c0_i32, %arg0, %arg1 : i32, i32, i32
  }
  func.func @transform_1(%arg0: i32, %arg1: i32) -> (i32, i32) {
    %c0_i32 = arith.constant 0 : i32
    return %arg0, %arg1 : i32, i32
  }
}

</mosaic_0001>

<bundles_post_ra>
// kernel: tpu_custom_call.1
= control target key start
LH: loop header
LB: loop body
LE: loop exit
PB: predicated region body
PF: predicated region fallthrough
CT: control target
= control target key end

     0   :  { %6 = vsyncpa [#allocation3], 0  ;;  %s189_s0 = inlined_call_operand.hbm [shape: f32[8,8,512], index: 0, kind: input, shape index: {}]   ;;  %s190_s1 = inlined_call_operand.hbm [shape: f32[8,512], index: 1, kind: output, shape index: {}]  }
   0x1   :  { %7 = vsyncpa [#allocation4], 0  ;;  %s12_s8 = sshll.u32 %s189_s0, 4  ;;  %s169_s9 = smov [#allocation2]   ;;  %s13_s8 = int_to_ptr.hbm [resolvable:$true] %s12_s8 }
   0x2   :  { %s14_s10 = sshll.u32 %s169_s9, 4  ;;  %s170_s11 = smov 512   ;;  %s15_s10 = int_to_ptr.vmem [resolvable:$true] %s14_s10 }
   0x3   :  { %s171_s12 = smov 32  }
   0x4   :  { %20 = dma.hbm_to_vmem [thread:$0]  %s13_s8, 4096, %s15_s10, [#allocation3], %s170_s11, %s170_s11, %s171_s12  }
   0x5   :  { %165 = dma.done.wait [#allocation3], 4096  }
   0x6   :  { %166 = vsyncadd [#allocation3], 4294963200  ;;  %v25_v0 = vld [vmem:[#allocation2] sm:$0xff]  ;;  %v26_v11 = vld [vmem:[#allocation2 + $0x8] sm:$0xff]  ;;  %s172_s0 = smov [#allocation5]   ;;  %s103_s16 = sshll.u32 %s190_s1, 4  ;;  %s104_s16 = int_to_ptr.hbm [resolvable:$true] %s103_s16 }
   0x7   :  { %v30_v1 = vld [vmem:[#allocation2 + $0x20] sm:$0xff]  ;;  %v31_v13 = vld [vmem:[#allocation2 + $0x28] sm:$0xff]  ;;  %v27_v25 = vld [vmem:[#allocation2 + $0x10] sm:$0xff]  ;;  %s101_s13 = sshll.u32 %s172_s0, 4  ;;  %s102_s13 = int_to_ptr.vmem [resolvable:$true] %s101_s13 }
   0x8   :  { %v39_v2 = vld [vmem:[#allocation2 + $0x40] sm:$0xff]  ;;  %v34_v3 = vmax.f32 %v25_v0, %v30_v1  ;;  %v40_v14 = vld [vmem:[#allocation2 + $0x48] sm:$0xff]  ;;  %v35_v17 = vmax.f32 %v26_v11, %v31_v13  ;;  %v32_v26 = vld [vmem:[#allocation2 + $0x30] sm:$0xff] }
   0x9   :  { %v44_v4 = vld [vmem:[#allocation2 + $0x60] sm:$0xff]  ;;  %v45_v15 = vld [vmem:[#allocation2 + $0x68] sm:$0xff]  ;;  %v36_v29 = vmax.f32 %v27_v25, %v32_v26  ;;  %v41_v30 = vld [vmem:[#allocation2 + $0x50] sm:$0xff] }
   0xa   :  { %v53_v5 = vld [vmem:[#allocation2 + $0x80] sm:$0xff]  ;;  %v48_v7 = vmax.f32 %v39_v2, %v44_v4  ;;  %v49_v18 = vmax.f32 %v40_v14, %v45_v15  ;;  %v54_v19 = vld [vmem:[#allocation2 + $0x88] sm:$0xff]  ;;  %v46_v31 = vld [vmem:[#allocation2 + $0x70] sm:$0xff] }
   0xb   :  { %v58_v6 = vld [vmem:[#allocation2 + $0xa0] sm:$0xff]  ;;  %v59_v20 = vld [vmem:[#allocation2 + $0xa8] sm:$0xff]  ;;  %v55_v32 = vld [vmem:[#allocation2 + $0x90] sm:$0xff]  ;;  %v50_v34 = vmax.f32 %v41_v30, %v46_v31 }
   0xc   :  { %v62_v8 = vmax.f32 %v53_v5, %v58_v6  ;;  %v67_v9 = vld [vmem:[#allocation2 + $0xc0] sm:$0xff]  ;;  %v80_v16 = vmax.f32 %v34_v3, %v48_v7  ;;  %v68_v21 = vld [vmem:[#allocation2 + $0xc8] sm:$0xff]  ;;  %v63_v23 = vmax.f32 %v54_v19, %v59_v20  ;;  %v81_v28 = vmax.f32 %v35_v17, %v49_v18  ;;  %v60_v35 = vld [vmem:[#allocation2 + $0xb0] sm:$0xff] }
   0xd   :  { %v72_v10 = vld [vmem:[#allocation2 + $0xe0] sm:$0xff]  ;;  %v73_v24 = vld [vmem:[#allocation2 + $0xe8] sm:$0xff]  ;;  %v69_v36 = vld [vmem:[#allocation2 + $0xd0] sm:$0xff]  ;;  %v64_v39 = vmax.f32 %v55_v32, %v60_v35  ;;  %v82_v44 = vmax.f32 %v36_v29, %v50_v34 }
   0xe   :  { %v76_v12 = vmax.f32 %v67_v9, %v72_v10  ;;  %v77_v27 = vmax.f32 %v68_v21, %v73_v24  ;;  %v74_v37 = vld [vmem:[#allocation2 + $0xf0] sm:$0xff]  ;;  %v28_v41 = vld [vmem:[#allocation2 + $0x18] sm:$0xff] }
   0xf   :  { %v78_v40 = vmax.f32 %v69_v36, %v74_v37  ;;  %v33_v42 = vld [vmem:[#allocation2 + $0x38] sm:$0xff] }
  0x10   :  { %v84_v22 = vmax.f32 %v62_v8, %v76_v12  ;;  %v85_v38 = vmax.f32 %v63_v23, %v77_v27  ;;  %v42_v43 = vld [vmem:[#allocation2 + $0x58] sm:$0xff]  ;;  %v37_v45 = vmax.f32 %v28_v41, %v33_v42 }
  0x11   :  { %v47_v46 = vld [vmem:[#allocation2 + $0x78] sm:$0xff]  ;;  %v86_v50 = vmax.f32 %v64_v39, %v78_v40 }
  0x12   :  { %v88_v33 = vmax.f32 %v80_v16, %v84_v22  ;;  %v56_v47 = vld [vmem:[#allocation2 + $0x98] sm:$0xff]  ;;  %v89_v49 = vmax.f32 %v81_v28, %v85_v38  ;;  %v51_v51 = vmax.f32 %v42_v43, %v47_v46 }
  0x13   :  { %v61_v48 = vld [vmem:[#allocation2 + $0xb8] sm:$0xff]  ;;  %v90_v56 = vmax.f32 %v82_v44, %v86_v50 }
  0x14   :  { %92 = vst [vmem:[#allocation5] sm:$0xff] %v88_v33  ;;  %v65_v52 = vmax.f32 %v56_v47, %v61_v48  ;;  %v70_v53 = vld [vmem:[#allocation2 + $0xd8] sm:$0xff]  ;;  %v83_v57 = vmax.f32 %v37_v45, %v51_v51 }
  0x15   :  { %v75_v54 = vld [vmem:[#allocation2 + $0xf8] sm:$0xff]  ;;  %93 = vst [vmem:[#allocation5 + $0x8] sm:$0xff] %v89_v49 }
  0x16   :  { %v79_v55 = vmax.f32 %v70_v53, %v75_v54  ;;  %94 = vst [vmem:[#allocation5 + $0x10] sm:$0xff] %v90_v56 }
  0x18   :  { %v87_v58 = vmax.f32 %v65_v52, %v79_v55 }
  0x1a   :  { %v91_v59 = vmax.f32 %v83_v57, %v87_v58 }
  0x1c   :  { %95 = vst [vmem:[#allocation5 + $0x18] sm:$0xff] %v91_v59 }
  0x1d   :  { %106 = dma.vmem_to_hbm [thread:$0]  %s102_s13, 512, %s104_s16, [#allocation4]  }
  0x1e   :  { %167 = dma.done.wait [#allocation4], 512  }
  0x1f   :  { %168 = vsyncadd [#allocation4], 4294966784 }
  0x20   :  { %111 = vsyncpa [#allocation3], 1 }
  0x21   :  { %112 = vsyncpa [#allocation4], 1 }

</bundles_post_ra>
